<compile_context>
chip_gen: v7x
topology: tpu7x:2x2x1
jax: 0.10.0
libtpu: 0.0.40
codegen_flags: <defaults>
</compile_context>

<pallas_src>
import jax
import jax.numpy as jnp
from jax.experimental import pallas as pl
from jax.experimental.pallas import tpu as pltpu

LN_EPS = 1e-5  # matches torch.nn.LayerNorm default


def _patch_merging_kernel(x_ref, we_ref, wo_ref, p_ref, o_ref):
    # x_ref : (rm, 2, W/2, 2C)  -- rm row-pairs, both row parities, all cols
    # we_ref: (2C, 2C) bf16     -- gamma-folded weight rows for parity 0 [x0|x2]
    # wo_ref: (2C, 2C) bf16     -- gamma-folded weight rows for parity 1 [x1|x3]
    # p_ref : (2, 2C)  f32      -- row 0 = colsum(We)+colsum(Wo), row 1 = beta @ W
    # o_ref : (rm*W/2, 2C)
    rm, _, wh, c2 = x_ref.shape
    t = rm * wh

    # Slice row parities straight off the ref (static offsets; free views).
    u0 = x_ref[:, 0, :, :].reshape(t, c2)   # parity-0 slab: [x0 | x2] channels
    u1 = x_ref[:, 1, :, :].reshape(t, c2)   # parity-1 slab: [x1 | x3] channels

    # MXU consumes the raw slabs; when x is bf16 these casts are no-ops.
    acc = jnp.dot(u0.astype(jnp.bfloat16), we_ref[...],
                  preferred_element_type=jnp.float32)
    acc = acc + jnp.dot(u1.astype(jnp.bfloat16), wo_ref[...],
                        preferred_element_type=jnp.float32)

    # LayerNorm statistics over the full 4C channels, f32, one-pass variance.
    u0f = u0.astype(jnp.float32)
    u1f = u1.astype(jnp.float32)
    inv_c4 = 1.0 / (2.0 * c2)
    mu = (jnp.sum(u0f, axis=-1, keepdims=True)
          + jnp.sum(u1f, axis=-1, keepdims=True)) * inv_c4
    ex2 = (jnp.sum(u0f * u0f, axis=-1, keepdims=True)
           + jnp.sum(u1f * u1f, axis=-1, keepdims=True)) * inv_c4
    var = jnp.maximum(ex2 - mu * mu, 0.0)
    inv = jax.lax.rsqrt(var + LN_EPS)

    wsum = p_ref[0:1, :]   # (1, 2C) column sums of the folded bf16 weights
    bias = p_ref[1:2, :]   # (1, 2C) beta @ W

    o_ref[...] = (inv * (acc - mu * wsum) + bias).astype(o_ref.dtype)


def _vmem_estimate(tokens, c2, in_isz, out_isz):
    """Rough per-step working set: double-buffered in/out blocks, weights,
    and f32 kernel intermediates."""
    in_blk = tokens * 2 * c2 * in_isz
    out_blk = tokens * c2 * out_isz
    wts = 2 * c2 * c2 * 2                 # two bf16 weight blocks
    interm = 4 * tokens * c2 * 4          # f32 intermediates (upper bound)
    return 2 * in_blk + 2 * out_blk + 2 * wts + interm + 8 * c2


def _pick_row_pairs(P, wh, c2, in_isz, out_isz, target_block_bytes, vmem_budget):
    """Pick row-pairs per grid step by bytes, keeping the output block
    sublane-aligned and (when possible) a grid of >= 2 steps."""
    align = 16 if out_isz < 4 else 8
    bytes_per_pair = 2 * wh * c2 * in_isz

    divisors = [d for d in range(1, P + 1) if P % d == 0]
    # Hard legality: output block sublane dim must be 8-aligned, or the block
    # must span the whole output (full-extent blocks are always legal).
    legal = [d for d in divisors if (d * wh) % 8 == 0 or d == P]
    fitting = [d for d in legal
               if d * bytes_per_pair <= target_block_bytes
               and _vmem_estimate(d * wh, c2, in_isz, out_isz) <= vmem_budget]
    if not fitting:
        # TODO(synk): pad P wrapper-side (ragged last block) for shapes with no
        # well-aligned divisor instead of falling back to the smallest legal one.
        return min(legal)
    preferred = [d for d in fitting if (d * wh) % align == 0] or fitting
    # Keep >= 2 grid steps when possible so v7x's two TensorCores both work.
    multi = [d for d in preferred if P // d >= 2] or preferred
    return max(multi)


def patch_merging(x, gamma, beta, weight, input_resolution, *,
                  target_block_bytes=4 * 1024 * 1024, out_dtype=None):
    """x: (B, H*W, C); gamma/beta: (4C,); weight: (4C, 2C) (= nn.Linear W.T)."""
    H, W = input_resolution
    B, L, C = x.shape
    assert L == H * W, "input feature has wrong size"
    assert H % 2 == 0 and W % 2 == 0, "x size is not even"

    wh = W // 2
    P = B * (H // 2)             # number of 2-row groups
    N = P * wh                   # merged token count
    C2, C4 = 2 * C, 4 * C
    out_dtype = x.dtype if out_dtype is None else jnp.dtype(out_dtype)
    in_isz = x.dtype.itemsize
    out_isz = out_dtype.itemsize

    # ---- parameter folding (once, at parameter-prep time in a real model) ----
    wg = gamma.astype(jnp.float32)[:, None] * weight.astype(jnp.float32)  # (4C,2C)
    # merged channel order is [x0,x1,x2,x3]; row-parity 0 holds [x0, x2],
    # row-parity 1 holds [x1, x3].
    w_even = jnp.concatenate([wg[0:C], wg[2 * C:3 * C]], axis=0).astype(jnp.bfloat16)
    w_odd = jnp.concatenate([wg[C:2 * C], wg[3 * C:4 * C]], axis=0).astype(jnp.bfloat16)
    # Column sums of the bf16-rounded weights -> exact post-matmul mean correction.
    wsum = (jnp.sum(w_even.astype(jnp.float32), axis=0)
            + jnp.sum(w_odd.astype(jnp.float32), axis=0))                  # (2C,)
    bias_row = beta.astype(jnp.float32) @ weight.astype(jnp.float32)       # (2C,)
    params = jnp.stack([wsum, bias_row], axis=0)                           # (2, 2C) f32

    # ---- free reshape (pure metadata): (B, H*W, C) -> (P, 2, W/2, 2C) ----
    xr = x.reshape(P, 2, wh, C2)

    vmem_budget = 36 * 1024 * 1024
    rm = _pick_row_pairs(P, wh, C2, in_isz, out_isz, target_block_bytes, vmem_budget)
    tokens = rm * wh                           # merged tokens per grid step
    grid = P // rm

    est = _vmem_estimate(tokens, C2, in_isz, out_isz)
    vmem_limit = int(max(32 * 1024 * 1024,
                         min(int(1.5 * est), 48 * 1024 * 1024)))

    cost = pl.CostEstimate(
        flops=2 * N * C4 * C2,
        transcendentals=N,
        bytes_accessed=(N * C4 * in_isz + N * C2 * out_isz
                        + 2 * C2 * C2 * 2 + 2 * C2 * 4),
    )

    out = pl.pallas_call(
        _patch_merging_kernel,
        out_shape=jax.ShapeDtypeStruct((N, C2), out_dtype),
        grid_spec=pltpu.PrefetchScalarGridSpec(
            num_scalar_prefetch=0,
            grid=(grid,),
            in_specs=[
                pl.BlockSpec((rm, 2, wh, C2), lambda i: (i, 0, 0, 0)),
                pl.BlockSpec((C2, C2), lambda i: (0, 0)),
                pl.BlockSpec((C2, C2), lambda i: (0, 0)),
                pl.BlockSpec((2, C2), lambda i: (0, 0)),
            ],
            out_specs=pl.BlockSpec((tokens, C2), lambda i: (i, 0)),
        ),
        compiler_params=pltpu.CompilerParams(
            dimension_semantics=("parallel",),
            vmem_limit_bytes=vmem_limit,
        ),
        cost_estimate=cost,
    )(xr, w_even, w_odd, params)

    return out.reshape(B, (H // 2) * wh, C2)


def _reference(x, gamma, beta, weight, input_resolution):
    H, W = input_resolution
    B, L, C = x.shape
    xv = x.reshape(B, H, W, C)
    x0 = xv[:, 0::2, 0::2, :]
    x1 = xv[:, 1::2, 0::2, :]
    x2 = xv[:, 0::2, 1::2, :]
    x3 = xv[:, 1::2, 1::2, :]
    xm = jnp.concatenate([x0, x1, x2, x3], -1).reshape(B, -1, 4 * C)
    mu = jnp.mean(xm, -1, keepdims=True)
    var = jnp.mean((xm - mu) ** 2, -1, keepdims=True)
    xn = (xm - mu) / jnp.sqrt(var + LN_EPS) * gamma + beta
    return jnp.einsum("bld,de->ble", xn, weight)


if __name__ == "__main__":
    # small shapes consistent with the module: B=2, dim=C=32, H=W=16
    B, C, H, W = 2, 32, 16, 16
    key = jax.random.PRNGKey(0)
    kx, kw, kg, kb = jax.random.split(key, 4)

    x32 = jax.random.normal(kx, (B, H * W, C), dtype=jnp.float32)
    gamma = 1.0 + 0.1 * jax.random.normal(kg, (4 * C,), dtype=jnp.float32)
    beta = 0.1 * jax.random.normal(kb, (4 * C,), dtype=jnp.float32)
    # nn.Linear(4C, 2C, bias=False): torch weight is (2C,4C); stored transposed (4C,2C)
    weight = (jax.random.normal(kw, (4 * C, 2 * C), dtype=jnp.float32)
              * (1.0 / jnp.sqrt(4.0 * C)))

    # ---- f32 activation path ----
    out32 = jax.block_until_ready(patch_merging(x32, gamma, beta, weight, (H, W)))
    assert out32.shape == (B, (H // 2) * (W // 2), 2 * C)
    ref32 = _reference(x32, gamma, beta, weight, (H, W))
    err32 = float(jnp.max(jnp.abs(out32 - ref32)))
    assert jnp.allclose(out32, ref32, atol=5e-2, rtol=5e-2), err32

    # ---- bf16 end-to-end path (preferred production path) ----
    xbf = x32.astype(jnp.bfloat16)
    outbf = jax.block_until_ready(patch_merging(xbf, gamma, beta, weight, (H, W)))
    assert outbf.dtype == jnp.bfloat16
    refbf = _reference(xbf.astype(jnp.float32), gamma, beta, weight, (H, W))
    errbf = float(jnp.max(jnp.abs(outbf.astype(jnp.float32) - refbf)))
    assert jnp.allclose(outbf.astype(jnp.float32), refbf, atol=1e-1, rtol=1e-1), errbf

    print("KERNEL_OK")
</pallas_src>

<mosaic_0001>
module attributes {stable_mosaic.version = 11 : i64} {
  func.func @_patch_merging_kernel(%arg0: i32, %arg1: memref<8x2x8x64xf32, #tpu.memory_space<vmem>>, %arg2: memref<64x64xbf16, #tpu.memory_space<vmem>>, %arg3: memref<64x64xbf16, #tpu.memory_space<vmem>>, %arg4: memref<2x64xf32, #tpu.memory_space<vmem>>, %arg5: memref<64x64xf32, #tpu.memory_space<vmem>>) attributes {dimension_semantics = [#tpu.dimension_semantics<parallel>], iteration_bounds = array<i64: 2>, scalar_prefetch = 0 : i64, scratch_operands = 0 : i64, tpu.core_type = #tpu.core_type<tc>, window_params = [{transform_indices = @transform_0, window_bounds = array<i64: 8, 2, 8, 64>}, {pipeline_mode = #tpu.pipeline_mode<synchronous>, transform_indices = @transform_1, window_bounds = array<i64: 64, 64>}, {pipeline_mode = #tpu.pipeline_mode<synchronous>, transform_indices = @transform_2, window_bounds = array<i64: 64, 64>}, {pipeline_mode = #tpu.pipeline_mode<synchronous>, transform_indices = @transform_3, window_bounds = array<i64: 2, 64>}, {transform_indices = @transform_4, window_bounds = array<i64: 64, 64>}]} {
    %c0 = arith.constant 0 : index
    %c0_0 = arith.constant 0 : index
    %c0_1 = arith.constant 0 : index
    %c0_2 = arith.constant 0 : index
    %0 = vector.load %arg1[%c0, %c0_0, %c0_1, %c0_2] : memref<8x2x8x64xf32, #tpu.memory_space<vmem>>, vector<8x1x8x64xf32>
    %1 = vector.shape_cast %0 : vector<8x1x8x64xf32> to vector<8x8x64xf32>
    %2 = vector.shape_cast %1 : vector<8x8x64xf32> to vector<64x64xf32>
    %c0_3 = arith.constant 0 : index
    %c1 = arith.constant 1 : index
    %c0_4 = arith.constant 0 : index
    %c0_5 = arith.constant 0 : index
    %3 = vector.load %arg1[%c0_3, %c1, %c0_4, %c0_5] : memref<8x2x8x64xf32, #tpu.memory_space<vmem>>, vector<8x1x8x64xf32>
    %4 = vector.shape_cast %3 : vector<8x1x8x64xf32> to vector<8x8x64xf32>
    %5 = vector.shape_cast %4 : vector<8x8x64xf32> to vector<64x64xf32>
    %6 = arith.truncf %2 : vector<64x64xf32> to vector<64x64xbf16>
    %c0_6 = arith.constant 0 : index
    %c0_7 = arith.constant 0 : index
    %7 = vector.load %arg2[%c0_6, %c0_7] : memref<64x64xbf16, #tpu.memory_space<vmem>>, vector<64x64xbf16>
    %cst = arith.constant dense<0.000000e+00> : vector<64x64xf32>
    %8 = tpu.matmul %6, %7, %cst {dimension_numbers = #tpu.dot_dimension_numbers<[1], [0], [0], [1], [0, 0, 1, 1], [], []>} : vector<64x64xbf16>, vector<64x64xbf16>, vector<64x64xf32> -> vector<64x64xf32>
    %9 = arith.truncf %5 : vector<64x64xf32> to vector<64x64xbf16>
    %c0_8 = arith.constant 0 : index
    %c0_9 = arith.constant 0 : index
    %10 = vector.load %arg3[%c0_8, %c0_9] : memref<64x64xbf16, #tpu.memory_space<vmem>>, vector<64x64xbf16>
    %cst_10 = arith.constant dense<0.000000e+00> : vector<64x64xf32>
    %11 = tpu.matmul %9, %10, %cst_10 {dimension_numbers = #tpu.dot_dimension_numbers<[1], [0], [0], [1], [0, 0, 1, 1], [], []>} : vector<64x64xbf16>, vector<64x64xbf16>, vector<64x64xf32> -> vector<64x64xf32>
    %12 = arith.addf %8, %11 : vector<64x64xf32>
    %cst_11 = arith.constant dense<0.000000e+00> : vector<64xf32>
    %13 = vector.multi_reduction <add>, %2, %cst_11 [1] : vector<64x64xf32> to vector<64xf32>
    %14 = vector.shape_cast %13 : vector<64xf32> to vector<64x1xf32>
    %cst_12 = arith.constant dense<0.000000e+00> : vector<64xf32>
    %15 = vector.multi_reduction <add>, %5, %cst_12 [1] : vector<64x64xf32> to vector<64xf32>
    %16 = vector.shape_cast %15 : vector<64xf32> to vector<64x1xf32>
    %17 = arith.addf %14, %16 : vector<64x1xf32>
    %cst_13 = arith.constant 7.812500e-03 : f32
    %18 = vector.broadcast %cst_13 : f32 to vector<64x1xf32>
    %19 = arith.mulf %17, %18 : vector<64x1xf32>
    %20 = arith.mulf %2, %2 : vector<64x64xf32>
    %cst_14 = arith.constant dense<0.000000e+00> : vector<64xf32>
    %21 = vector.multi_reduction <add>, %20, %cst_14 [1] : vector<64x64xf32> to vector<64xf32>
    %22 = vector.shape_cast %21 : vector<64xf32> to vector<64x1xf32>
    %23 = arith.mulf %5, %5 : vector<64x64xf32>
    %cst_15 = arith.constant dense<0.000000e+00> : vector<64xf32>
    %24 = vector.multi_reduction <add>, %23, %cst_15 [1] : vector<64x64xf32> to vector<64xf32>
    %25 = vector.shape_cast %24 : vector<64xf32> to vector<64x1xf32>
    %26 = arith.addf %22, %25 : vector<64x1xf32>
    %cst_16 = arith.constant 7.812500e-03 : f32
    %27 = vector.broadcast %cst_16 : f32 to vector<64x1xf32>
    %28 = arith.mulf %26, %27 : vector<64x1xf32>
    %29 = arith.mulf %19, %19 : vector<64x1xf32>
    %30 = arith.subf %28, %29 : vector<64x1xf32>
    %cst_17 = arith.constant 0.000000e+00 : f32
    %31 = vector.broadcast %cst_17 : f32 to vector<64x1xf32>
    %32 = arith.maximumf %30, %31 : vector<64x1xf32>
    %cst_18 = arith.constant 9.99999974E-6 : f32
    %33 = vector.broadcast %cst_18 : f32 to vector<64x1xf32>
    %34 = arith.addf %32, %33 : vector<64x1xf32>
    %35 = math.rsqrt %34 : vector<64x1xf32>
    %c0_19 = arith.constant 0 : index
    %c0_20 = arith.constant 0 : index
    %36 = vector.load %arg4[%c0_19, %c0_20] : memref<2x64xf32, #tpu.memory_space<vmem>>, vector<1x64xf32>
    %c1_21 = arith.constant 1 : index
    %c0_22 = arith.constant 0 : index
    %37 = vector.load %arg4[%c1_21, %c0_22] : memref<2x64xf32, #tpu.memory_space<vmem>>, vector<1x64xf32>
    %38 = vector.broadcast %19 : vector<64x1xf32> to vector<64x64xf32>
    %39 = vector.broadcast %36 : vector<1x64xf32> to vector<64x64xf32>
    %40 = arith.mulf %38, %39 : vector<64x64xf32>
    %41 = arith.subf %12, %40 : vector<64x64xf32>
    %42 = vector.broadcast %35 : vector<64x1xf32> to vector<64x64xf32>
    %43 = arith.mulf %42, %41 : vector<64x64xf32>
    %44 = vector.broadcast %37 : vector<1x64xf32> to vector<64x64xf32>
    %45 = arith.addf %43, %44 : vector<64x64xf32>
    %c0_23 = arith.constant 0 : index
    %c0_24 = arith.constant 0 : index
    %46 = vector.load %arg5[%c0_23, %c0_24] : memref<64x64xf32, #tpu.memory_space<vmem>>, vector<64x64xf32>
    tpu.vector_store %arg5[%c0_23, %c0_24], %45 {strides = array<i32>} : memref<64x64xf32, #tpu.memory_space<vmem>>, vector<64x64xf32>,
    return
  }
  func.func @transform_0(%arg0: i32) -> (i32, i32, i32, i32) {
    %c0_i32 = arith.constant 0 : i32
    %c0_i32_0 = arith.constant 0 : i32
    %c0_i32_1 = arith.constant 0 : i32
    %c0_i32_2 = arith.constant 0 : i32
    return %arg0, %c0_i32, %c0_i32_0, %c0_i32_1 : i32, i32, i32, i32
  }
  func.func @transform_1(%arg0: i32) -> (i32, i32) {
    %c0_i32 = arith.constant 0 : i32
    %c0_i32_0 = arith.constant 0 : i32
    %c0_i32_1 = arith.constant 0 : i32
    return %c0_i32, %c0_i32_0 : i32, i32
  }
  func.func @transform_2(%arg0: i32) -> (i32, i32) {
    %c0_i32 = arith.constant 0 : i32
    %c0_i32_0 = arith.constant 0 : i32
    %c0_i32_1 = arith.constant 0 : i32
    return %c0_i32, %c0_i32_0 : i32, i32
  }
  func.func @transform_3(%arg0: i32) -> (i32, i32) {
    %c0_i32 = arith.constant 0 : i32
    %c0_i32_0 = arith.constant 0 : i32
    %c0_i32_1 = arith.constant 0 : i32
    return %c0_i32, %c0_i32_0 : i32, i32
  }
  func.func @transform_4(%arg0: i32) -> (i32, i32) {
    %c0_i32 = arith.constant 0 : i32
    %c0_i32_0 = arith.constant 0 : i32
    return %arg0, %c0_i32 : i32, i32
  }
}

</mosaic_0001>

<bundles_post_ra>
// kernel: tpu_custom_call.1
= control target key start
LH: loop header
LB: loop body
LE: loop exit
PB: predicated region body
PF: predicated region fallthrough
CT: control target
= control target key end

     0   :  { %9 = vsyncpa [#allocation3], 0  ;;  %s1560_s0 = inlined_call_operand.hbm [shape: f32[16,2,8,64], index: 0, kind: input, shape index: {}]   ;;  %s1561_s1 = inlined_call_operand.hbm [shape: bf16[64,64], index: 1, kind: input, shape index: {}]   ;;  %s1562_s2 = inlined_call_operand.hbm [shape: bf16[64,64], index: 2, kind: input, shape index: {}]   ;;  %s1563_s3 = inlined_call_operand.vmem [shape: f32[2,64], index: 3, kind: input, shape index: {}]   ;;  %s1564_s4 = inlined_call_operand.vmem [shape: f32[128,64], index: 4, kind: output, shape index: {}]  }
   0x1   :  { %11 = vsyncpa [#allocation3 + $0x1], 0 }
   0x2   :  { %12 = vsyncpa [#allocation5], 0  ;;  %s1163_s15 = smov 0   ;;  %s1165_s16 = smov 0  }
   0x3   :  { %s1167_s17 = smov 0   ;;  %s1169_s18 = smov 0  }
   0x4 LB: > { %s815_s19 = sadd.s32 4294967295, %s1129_s18   ;;  %p38_p0 = scmp.ne.s32.totalorder %s1121_s16, %s1117_s15  ;;  %s1129_s18 = sphi %s1169_s18, %s1580_s18   ;;  %s1125_s17 = sphi %s1167_s17, %s1579_s17   ;;  %s1121_s16 = sphi %s1165_s16, %s1578_s16   ;;  %s1117_s15 = sphi %s1163_s15, %s1577_s15  }
   0x5   : > { %p1185_p1 = scmp.eq.s32.totalorder %s815_s19, 0  ;;  %p817_p2 = scmp.ge.s32.totalorder %s1129_s18, 1 }
   0x6   : > { %p138_p3 = scmp.lt.s32.totalorder %s1129_s18, 3  ;;  %s1131_s23 = smov [#allocation4]  }
   0x7   : > { %s1569_s20 = scalar_select %p1185_p1, 1, 0 }
   0x8   : > { %p1193_p4 = por %p1185_p1, %p38_p0  ;;  %p1197_p5 = pnand %p817_p2, %p138_p3 }
   0x9   : > { %s150_s24 = sshll.u32 %s1131_s23, 4  ;;  %s1132_s26 = smov [#allocation6]   ;;  %s151_s24 = int_to_ptr.vmem [resolvable:$true] %s150_s24 }
   0xa   : > { %s1570_s21 = scalar_select %p1193_p4, 1, 0 }
   0xb   : > { %s1571_s22 = scalar_select %p1197_p5, 1, 0 }
   0xc   : > { %p927_p6 = pneg %p1197_p5  ;;  %s163_s27 = sshll.u32 %s1132_s26, 4  ;;  %s1209_s27 = int_to_ptr.vmem [resolvable:$true] %s163_s27 }
   0xd   : > { %s1005_s30 = scalar_lea.hbm %s1561_s1, 512 }
   0xe   : > { %p1205_p7 = pnand %p927_p6, %p1185_p1  ;;  %p1006_p8 = scmp.ne.s32.totalorder %s1561_s1, %s1005_s30 }
   0xf   : > { %p1012_p12 = scmp.lt.u32.totalorder %s1005_s30, %s1561_s1 }
  0x10   : > { %p1007_p9 = pneg %p1205_p7 }
  0x12   : > { %p1008_p10 = pnand %p1007_p9, %p1006_p8 }
  0x14   : > { %p1009_p11 = pneg %p1008_p10 }
  0x16   : > { %p1014_p13 = pnand %p1012_p12, %p1009_p11 }
  0x18   : > { %1017 = shalt.err (!%p1014_p13)
}
  0x19   : > { %s1018_s9 = scalar_lea.vmem %s151_s24, 512  ;;  %p1026_p6 = scmp.lt.s32.totalorder %s151_s24, %s151_s24 }
  0x1a   : > { %p1019_p0 = scmp.ne.s32.totalorder %s151_s24, %s1018_s9  ;;  %p1027_p1 = scmp.lt.s32.totalorder %s1018_s9, %s1018_s9 }
  0x1c   : > { %p1021_p2 = pnand %p1019_p0, %p1007_p9  ;;  %p1028_p4 = por %p1027_p1, %p1026_p6 }
  0x1e   : > { %p1022_p3 = pneg %p1021_p2 }
  0x20   : > { %p1029_p5 = pnand %p1028_p4, %p1022_p3 }
  0x22   : > { %1032 = shalt.err (!%p1029_p5)
}
  0x23   : > { %s1133_s10 = smov 64   ;;  %s1134_s11 = smov 4  }
  0x24   : > { %930 = dma.hbm_to_vmem [thread:$0]  (!%p1205_p7), %s1561_s1, 512, %s151_s24, [#allocation5], %s1133_s10, %s1133_s10, %s1134_s11  }
  0x25   : > { %s1033_s23 = scalar_lea.hbm %s1562_s2, 512 }
  0x26   : > { %p1034_p8 = scmp.ne.s32.totalorder %s1562_s2, %s1033_s23  ;;  %p1040_p5 = scmp.lt.u32.totalorder %s1033_s23, %s1562_s2 }
  0x28   : > { %p1036_p1 = pnand %p1034_p8, %p1007_p9 }
  0x2a   : > { %p1037_p4 = pneg %p1036_p1 }
  0x2c   : > { %p1042_p10 = pnand %p1040_p5, %p1037_p4 }
  0x2e   : > { %1045 = shalt.err (!%p1042_p10)
}
  0x2f   : > { %s1046_s24 = scalar_lea.vmem %s1209_s27, 512  ;;  %p1054_p0 = scmp.lt.s32.totalorder %s1209_s27, %s1209_s27 }
  0x30   : > { %p1047_p11 = scmp.ne.s32.totalorder %s1209_s27, %s1046_s24  ;;  %p1055_p2 = scmp.lt.s32.totalorder %s1046_s24, %s1046_s24 }
  0x32   : > { %p1049_p12 = pnand %p1047_p11, %p1007_p9  ;;  %p1056_p3 = por %p1055_p2, %p1054_p0 }
  0x34   : > { %p1050_p13 = pneg %p1049_p12 }
  0x36   : > { %p1057_p6 = pnand %p1056_p3, %p1050_p13 }
  0x38   : > { %1060 = shalt.err (!%p1057_p6)
}
  0x39   : > { %933 = dma.hbm_to_vmem [thread:$0]  (!%p1205_p7), %s1562_s2, 512, %s1209_s27, [#allocation5], %s1133_s10, %s1133_s10, %s1134_s11  }
  0x3a   : > { %s1259_s7 = sadd.s32 1, %s1129_s18   ;;  %s25_s8 = sadd.s32 1, %s1125_s17 }
  0x3b   : > { %s22_s25 = ssub.s32 %s1129_s18, %s1259_s7  ;;  %p32_p9 = scmp.ne.s32.totalorder %s1125_s17, %s1121_s16 }
  0x3c   : > { %p23_p8 = scmp.eq.s32.totalorder %s22_s25, 0  ;;  %p33_p1 = scmp.eq.s32.totalorder %s1129_s18, 0 }
  0x3d   : > { %p940_p4 = scmp.lt.s32.totalorder %s1129_s18, 2  ;;  %s180_s9 = sand.u32 1, %s1125_s17  }
  0x3e   : > { %s1270_s12 = scalar_select %p23_p8, %s1125_s17, %s25_s8  }
  0x3f   : > { %p34_p5 = por %p33_p1, %p32_p9  ;;  %s821_s13 = sshll.u32 %s180_s9, 7 }
  0x40   : > { %s860_s14 = sshll.u32 %s1129_s18, 11  ;;  %s184_s27 = scalar_lea.vmem [#allocation2], %s821_s13 }
  0x41   : > { %s1276_s26 = scalar_lea.hbm %s1560_s0, %s860_s14  ;;  %s192_s10 = sshll.u32 %s184_s27, 4  ;;  %s1282_s10 = int_to_ptr.vmem [resolvable:$true] %s192_s10 }
  0x42   : > { %p1278_p7 = pnand %p940_p4, %p34_p5  ;;  %s1284_s28 = scalar_lea.sflag [#allocation3], %s180_s9 }
  0x43   : > { %s1061_s29 = scalar_lea.hbm %s1276_s26, 2048  ;;  %s1066_s5 = scalar_lea.hbm %s1560_s0, 4096 }
  0x44   : > { %p1062_p10 = scmp.ne.s32.totalorder %s1276_s26, %s1061_s29  ;;  %p1063_p11 = pneg %p1278_p7 }
  0x45   : > { %p1067_p0 = scmp.lt.u32.totalorder %s1276_s26, %s1560_s0  ;;  %p1068_p2 = scmp.lt.u32.totalorder %s1066_s5, %s1061_s29 }
  0x46   : > { %p1064_p12 = pnand %p1063_p11, %p1062_p10  ;;  %p1070_p6 = scmp.lt.u32.totalorder %s1061_s29, %s1276_s26 }
  0x47   : > { %p1069_p3 = por %p1068_p2, %p1067_p0 }
  0x48   : > { %p1065_p13 = pneg %p1064_p12 }
  0x49   : > { %p1071_p9 = por %p1070_p6, %p1069_p3 }
  0x4b   : > { %p1072_p8 = pnand %p1071_p9, %p1065_p13 }
  0x4d   : > { %1075 = shalt.err (!%p1072_p8)
}
  0x4e   : > { %s1076_s25 = scalar_lea.vmem %s1282_s10, 2048  ;;  %s1135_s9 = smov [#allocation2]  }
  0x4f   : > { %p1077_p1 = scmp.ne.s32.totalorder %s1282_s10, %s1076_s25  ;;  %s1081_s13 = sshll.u32 %s1135_s9, 4  ;;  %s1082_s13 = int_to_ptr.vmem [resolvable:$false] %s1081_s13 }
  0x50   : > { %s1083_s14 = scalar_lea.vmem %s1082_s13, 4096  ;;  %p1084_p10 = scmp.lt.s32.totalorder %s1282_s10, %s1082_s13 }
  0x51   : > { %p1079_p4 = pnand %p1077_p1, %p1063_p11  ;;  %p1085_p12 = scmp.lt.s32.totalorder %s1083_s14, %s1076_s25 }
  0x53   : > { %p1080_p5 = pneg %p1079_p4  ;;  %p1086_p0 = por %p1085_p12, %p1084_p10 }
  0x55   : > { %p1087_p2 = pnand %p1086_p0, %p1080_p5 }
  0x57   : > { %1090 = shalt.err (!%p1087_p2)
}
  0x58   : > { %s1136_s15 = smov 128   ;;  %s1137_s23 = smov 8  }
  0x59   : > { %937 = dma.hbm_to_vmem [thread:$0]  (!%p1278_p7), %s1276_s26, 2048, %s1282_s10, %s1284_s28, %s1136_s15, %s1136_s15, %s1137_s23  }
  0x5a   : > { %p1574_p11 = scmp.ne.s32.totalorder %s1571_s22, 0 }
  0x5b   : > { %s206_s27 = sand.u32 (!%p1574_p11), 1, %s1121_s16   ;;  %p1575_p13 = scmp.ne.s32.totalorder (!%p1574_p11), %s1570_s21, 0 }
  0x5c   : > { %204 = sbr.rel (%p1574_p11) target bundleno = 355 (0x163), region = 36  ;;  %s826_s29 = sshll.u32 (!%p1574_p11), %s206_s27, 7 }
  0x5d   : > { %s207_s30 = scalar_lea.sflag (!%p1574_p11), [#allocation3], %s206_s27  ;;  %s1315_s24 = scalar_lea.vmem (!%p1574_p11), [#allocation2], %s826_s29 }
  0x63   : > { %1108 = dma.done.wait (%p1575_p13), %s207_s30, 2048  }
  0x64   : > { %1110 = vsyncadd (%p1575_p13), %s207_s30, 4294965248  ;;  %p1576_p3 = scmp.ne.s32.totalorder %s1569_s20, 0 }
  0x66   : > { %1112 = dma.done.wait (%p1576_p3), [#allocation5], 1024  }
  0x67   : > { %1114 = vsyncadd (%p1576_p3), [#allocation5], 4294966272  ;;  %vm316_vm0 = vcmask 523264   ;;  %v1326_v0 = vld [vmem:[%s1315_s24 + $0x20] sm:$0xff]  ;;  %v1336_v6 = vld [vmem:[%s1315_s24 + $0x30] sm:$0xff]  ;;  %s829_s20 = sshll.u32 %s815_s19, 3 }
  0x68   : > { %v1329_v1 = vld [vmem:[%s1315_s24] sm:$0xff]  ;;  %v501_v2 = vsel %vm316_vm0, %v1326_v0, 0.0  ;;  %v504_v7 = vsel %vm316_vm0, %v1336_v6, 0.0  ;;  %v1341_v8 = vld [vmem:[%s1315_s24 + $0x10] sm:$0xff]  ;;  %v983_v10 = vld [vmem:[#allocation6 + $0x8] sm:$0xff]   ;;  %v269_v32 = vpack.c.bf16 %v1336_v6, %v1326_v0  ;;  %v562_v52 = vmul.f32 %v1336_v6, %v1336_v6  ;;  %p245_p7 = scmp.lt.s32.totalorder %s829_s20, 15 }
  0x69   : > { %v495_v3 = vsel %vm316_vm0, %v1329_v1, 0.0  ;;  %v981_v4 = vld [vmem:[#allocation6] sm:$0xff]   ;;  %502 = vadd.xlane.f32.xlu1 %v501_v2  ;;  %v498_v9 = vsel %vm316_vm0, %v1341_v8, 0.0  ;;  %v984_v11 = vld [vmem:[#allocation4 + $0x8] sm:$0xff]   ;;  %v1346_v12 = vld [vmem:[%s1315_s24 + $0x50] sm:$0xff]  ;;  %v268_v14 = vpack.c.bf16 %v1341_v8, %v1329_v1  ;;  %v560_v48 = vmul.f32 %v1341_v8, %v1341_v8 }
  0x6a   : > { %v982_v5 = vld [vmem:[#allocation4] sm:$0xff]   ;;  %496 = vadd.xlane.f32.xlu0 %v495_v3  ;;  %877 = vmatprep.subr.bf16.mxu1 %v981_v4  ;;  %v510_v15 = vsel %vm316_vm0, %v1346_v12, 0.0  ;;  %v985_v17 = vld [vmem:[#allocation6 + $0x10] sm:$0xff]   ;;  %v987_v21 = vld [vmem:[#allocation6 + $0x18] sm:$0xff]   ;;  %v559_v49 = vmul.f32 %v1329_v1, %v1329_v1  ;;  %v561_v53 = vmul.f32 %v1326_v0, %v1326_v0  ;;  %v576_v54 = vsel %vm316_vm0, %v562_v52, 0.0  ;;  %s1582_s20 = smov (!%p245_p7, %s829_s20), 15 }
  0x6b   : > { %893 = vmatprep.subr.bf16.mxu0 %v982_v5  ;;  %878 = vmatpush3.bf16.msra.mxu1 %v981_v4  ;;  %v1349_v13 = vld [vmem:[%s1315_s24 + $0x40] sm:$0xff]  ;;  %v986_v18 = vld [vmem:[#allocation4 + $0x10] sm:$0xff]   ;;  %v988_v24 = vld [vmem:[#allocation4 + $0x18] sm:$0xff]   ;;  %v570_v50 = vsel %vm316_vm0, %v560_v48, 0.0  ;;  %v564_v56 = vmul.f32 %v1346_v12, %v1346_v12  ;;  %s830_s18 = sshll.u32 %s1582_s20, 3 }
  0x6c   : > { %894 = vmatpush3.bf16.msra.mxu0 %v982_v5  ;;  %879 = vmatprep.subr.bf16.mxu1 %v983_v10  ;;  %v507_v16 = vsel %vm316_vm0, %v1349_v13, 0.0  ;;  %v1358_v19 = vld [vmem:[%s1315_s24 + $0x70] sm:$0xff]  ;;  %v1361_v20 = vld [vmem:[%s1315_s24 + $0x60] sm:$0xff]  ;;  %v1369_v25 = vld [vmem:[%s1315_s24 + $0x8] sm:$0xff]  ;;  %v270_v36 = vpack.c.bf16 %v1346_v12, %v1349_v13  ;;  %v567_v51 = vsel %vm316_vm0, %v559_v49, 0.0  ;;  %v573_v55 = vsel %vm316_vm0, %v561_v53, 0.0  ;;  %s1521_s28 = scalar_lea.vmem %s1564_s4, %s830_s18 }
  0x6d   : > { %505 = vadd.xlane.f32.xlu1 %v504_v7  ;;  %895 = vmatprep.subr.bf16.mxu0 %v984_v11  ;;  %v516_v22 = vsel %vm316_vm0, %v1358_v19, 0.0  ;;  %v513_v23 = vsel %vm316_vm0, %v1361_v20, 0.0  ;;  %v1372_v26 = vld [vmem:[%s1315_s24 + $0x18] sm:$0xff]  ;;  %v1377_v28 = vld [vmem:[%s1315_s24 + $0x28] sm:$0xff]  ;;  %v519_v34 = vsel %vm316_vm0, %v1369_v25, 0.0  ;;  %v271_v42 = vpack.c.bf16 %v1358_v19, %v1361_v20 }
  0x6e   : > { %499 = vadd.xlane.f32.xlu0 %v498_v9  ;;  %901 = vmatprep.mubr.msk.bf16.mxu0 %vm316_vm0, %v268_v14  ;;  %v280_v27 = vpack.c.bf16 %v1372_v26, %v1369_v25  ;;  %v1380_v29 = vld [vmem:[%s1315_s24 + $0x38] sm:$0xff]  ;;  %v1383_v30 = vld [vmem:[%s1315_s24 + $0x48] sm:$0xff]  ;;  %v522_v33 = vsel %vm316_vm0, %v1372_v26, 0.0  ;;  %v525_v39 = vsel %vm316_vm0, %v1377_v28, 0.0  ;;  %v563_v57 = vmul.f32 %v1349_v13, %v1349_v13 }
  0x6f   : > { %880 = vmatpush3.bf16.msra.mxu1 %v983_v10  ;;  %v1386_v31 = vld [vmem:[%s1315_s24 + $0x58] sm:$0xff]  ;;  %v281_v35 = vpack.c.bf16 %v1380_v29, %v1377_v28  ;;  %v528_v38 = vsel %vm316_vm0, %v1380_v29, 0.0  ;;  %v837_v40 = vld [vmem:[%s1315_s24 + $0x68] sm:$0xff]  ;;  %v531_v44 = vsel %vm316_vm0, %v1383_v30, 0.0  ;;  %v582_v58 = vsel %vm316_vm0, %v564_v56, 0.0 }
  0x70   : > { %896 = vmatpush3.bf16.msra.mxu0 %v984_v11  ;;  %881 = vmatprep.subr.bf16.mxu1 %v985_v17  ;;  %v282_v37 = vpack.c.bf16 %v1386_v31, %v1383_v30  ;;  %v838_v41 = vld [vmem:[%s1315_s24 + $0x78] sm:$0xff]  ;;  %v534_v43 = vsel %vm316_vm0, %v1386_v31, 0.0  ;;  %v537_v47 = vsel %vm316_vm0, %v837_v40, 0.0  ;;  %v579_v59 = vsel %vm316_vm0, %v563_v57, 0.0 }
  0x71   : > { %511 = vadd.xlane.f32.xlu1 %v510_v15  ;;  %897 = vmatprep.subr.bf16.mxu0 %v986_v18  ;;  %v283_v45 = vpack.c.bf16 %v838_v41, %v837_v40  ;;  %v540_v46 = vsel %vm316_vm0, %v838_v41, 0.0  ;;  %v566_v60 = vmul.f32 %v1358_v19, %v1358_v19  ;;  %v565_v61 = vmul.f32 %v1361_v20, %v1361_v20 }
  0x72   : > { %508 = vadd.xlane.f32.xlu0 %v507_v16  ;;  %885 = vmatprep.mubr.msk.bf16.mxu1 %vm316_vm0, %v280_v27  ;;  %v592_v0 = vmul.f32 %v1372_v26, %v1372_v26  ;;  %v591_v1 = vmul.f32 %v1369_v25, %v1369_v25  ;;  %v594_v4 = vmul.f32 %v1380_v29, %v1380_v29 }
  0x73   : > { %882 = vmatpush3.bf16.msra.mxu1 %v985_v17  ;;  %v588_v62 = vsel %vm316_vm0, %v566_v60, 0.0  ;;  %v585_v63 = vsel %vm316_vm0, %v565_v61, 0.0  ;;  %v593_v5 = vmul.f32 %v1377_v28, %v1377_v28  ;;  %v596_v8 = vmul.f32 %v1386_v31, %v1386_v31 }
  0x74   : > { %898 = vmatpush3.bf16.msra.mxu0 %v986_v18  ;;  %883 = vmatprep.subr.bf16.mxu1 %v987_v21  ;;  %v602_v2 = vsel %vm316_vm0, %v592_v0, 0.0  ;;  %v599_v3 = vsel %vm316_vm0, %v591_v1, 0.0  ;;  %v608_v6 = vsel %vm316_vm0, %v594_v4, 0.0  ;;  %v595_v9 = vmul.f32 %v1383_v30, %v1383_v30 }
  0x75   : > { %899 = vmatprep.subr.bf16.mxu0 %v988_v24  ;;  %517 = vadd.xlane.f32.xlu1 %v516_v22  ;;  %v605_v7 = vsel %vm316_vm0, %v593_v5, 0.0  ;;  %v614_v10 = vsel %vm316_vm0, %v596_v8, 0.0  ;;  %v598_v12 = vmul.f32 %v838_v41, %v838_v41  ;;  %v597_v13 = vmul.f32 %v837_v40, %v837_v40 }
  0x76   : > { %514 = vadd.xlane.f32.xlu0 %v513_v23  ;;  %v611_v11 = vsel %vm316_vm0, %v595_v9, 0.0 }
  0x77   : > { %884 = vmatpush3.bf16.msra.mxu1 %v987_v21  ;;  %v620_v14 = vsel %vm316_vm0, %v598_v12, 0.0  ;;  %v617_v15 = vsel %vm316_vm0, %v597_v13, 0.0 }
  0x78   : > { %900 = vmatpush3.bf16.msra.mxu0 %v988_v24 }
  0x79   : > { %523 = vadd.xlane.f32.xlu1 %v522_v33 }
  0x7a   : > { %520 = vadd.xlane.f32.xlu0 %v519_v34  ;;  %886 = vmatmul.mubr.msk.bf16.vlgmr.msra.gmra.mrb[0].mxu1 %vm316_vm0, %v281_v35 }
  0x7b   : > { %902 = vmatmul.mubr.msk.bf16.vlgmr.msra.gmra.mrb[0].mxu0 %vm316_vm0, %v269_v32  ;;  %889 = vmatprep.mubr.msk.bf16.mxu1 %vm316_vm0, %v282_v37 }
  0x7c   : > { %905 = vmatprep.mubr.msk.bf16.mxu0 %vm316_vm0, %v270_v36 }
  0x7d   : > { %529 = vadd.xlane.f32.xlu1 %v528_v38 }
  0x7e   : > { %526 = vadd.xlane.f32.xlu0 %v525_v39 }
  0x81   : > { %535 = vadd.xlane.f32.xlu1 %v534_v43 }
  0x82   : > { %532 = vadd.xlane.f32.xlu0 %v531_v44  ;;  %890 = vmatmul.mubr.msk.bf16.gmra.mrb[4].mxu1 %vm316_vm0, %v283_v45 }
  0x83   : > { %906 = vmatmul.mubr.msk.bf16.gmra.mrb[4].mxu0 %vm316_vm0, %v271_v42 }
  0x85   : > { %541 = vadd.xlane.f32.xlu1 %v540_v46 }
  0x86   : > { %538 = vadd.xlane.f32.xlu0 %v537_v47 }
  0x89   : > { %571 = vadd.xlane.f32.xlu1 %v570_v50 }
  0x8a   : > { %568 = vadd.xlane.f32.xlu0 %v567_v51 }
  0x8d   : > { %577 = vadd.xlane.f32.xlu1 %v576_v54 }
  0x8e   : > { %574 = vadd.xlane.f32.xlu0 %v573_v55 }
  0x91   : > { %583 = vadd.xlane.f32.xlu1 %v582_v58 }
  0x92   : > { %580 = vadd.xlane.f32.xlu0 %v579_v59 }
  0x95   : > { %589 = vadd.xlane.f32.xlu1 %v588_v62 }
  0x96   : > { %586 = vadd.xlane.f32.xlu0 %v585_v63 }
  0x99   : > { %603 = vadd.xlane.f32.xlu1 %v602_v2 }
  0x9a   : > { %600 = vadd.xlane.f32.xlu0 %v599_v3 }
  0x9d   : > { %609 = vadd.xlane.f32.xlu1 %v608_v6 }
  0x9e   : > { %606 = vadd.xlane.f32.xlu0 %v605_v7 }
  0xa1   : > { %615 = vadd.xlane.f32.xlu1 %v614_v10 }
  0xa2   : > { %612 = vadd.xlane.f32.xlu0 %v611_v11 }
  0xa5   : > { %621 = vadd.xlane.f32.xlu1 %v620_v14 }
  0xa6   : > { %618 = vadd.xlane.f32.xlu0 %v617_v15 }
  0xf6   : > { %v503_v16 = vpop.xlane.xlu1 %502 }
  0xf7   : > { %v497_v17 = vpop.xlane.xlu0 %496 }
  0xfa   : > { %v506_v18 = vpop.xlane.xlu1 %505 }
  0xfb   : > { %v500_v19 = vpop.xlane.xlu0 %499 }
  0xfe   : > { %v512_v20 = vpop.xlane.xlu1 %511 }
  0xff   : > { %v509_v21 = vpop.xlane.xlu0 %508 }
 0x102   : > { %v518_v22 = vpop.xlane.xlu1 %517 }
 0x103   : > { %v515_v23 = vpop.xlane.xlu0 %514 }
 0x106   : > { %v524_v24 = vpop.xlane.xlu1 %523 }
 0x107   : > { %v521_v25 = vpop.xlane.xlu0 %520  ;;  %v544_v49 = vadd.f32 %v524_v24, %v500_v19 }
 0x108   : > { %v543_v45 = vadd.f32 %v521_v25, %v497_v17 }
 0x109   : > { %v1471_v58 = vmul.f32 0.0078125, %v544_v49 }
 0x10a   : > { %v530_v26 = vpop.xlane.xlu1 %529  ;;  %v1467_v54 = vmul.f32 0.0078125, %v543_v45 }
 0x10b   : > { %v527_v27 = vpop.xlane.xlu0 %526  ;;  %v546_v47 = vadd.f32 %v530_v26, %v506_v18  ;;  %v640_v8 = vmul.f32 %v1471_v58, %v1471_v58 }
 0x10c   : > { %v545_v44 = vadd.f32 %v527_v27, %v503_v16  ;;  %v639_v0 = vmul.f32 %v1467_v54, %v1467_v54 }
 0x10d   : > { %v1469_v56 = vmul.f32 0.0078125, %v546_v47 }
 0x10e   : > { %v536_v28 = vpop.xlane.xlu1 %535  ;;  %v1465_v52 = vmul.f32 0.0078125, %v545_v44  ;;  %v1502_v44 = vld [vmem:[%s1563_s3] ss:$0 sm:$0xff] }
 0x10f   : > { %v533_v29 = vpop.xlane.xlu0 %532  ;;  %v642_v4 = vmul.f32 %v1469_v56, %v1469_v56  ;;  %v548_v9 = vadd.f32 %v536_v28, %v512_v20 }
 0x110   : > { %v641_v61 = vmul.f32 %v1465_v52, %v1465_v52  ;;  %v547_v1 = vadd.f32 %v533_v29, %v509_v21 }
 0x112   : > { %v542_v30 = vpop.xlane.xlu1 %541  ;;  %v1483_v15 = vmul.f32 0.0078125, %v547_v1 }
 0x113   : > { %v539_v31 = vpop.xlane.xlu0 %538  ;;  %v550_v5 = vadd.f32 %v542_v30, %v518_v22  ;;  %v1487_v22 = vmul.f32 0.0078125, %v548_v9 }
 0x114   : > { %v549_v62 = vadd.f32 %v539_v31, %v515_v23  ;;  %v643_v27 = vmul.f32 %v1483_v15, %v1483_v15 }
 0x115   : > { %v1485_v18 = vmul.f32 0.0078125, %v550_v5 }
 0x116   : > { %v572_v32 = vpop.xlane.xlu1 %571  ;;  %v1481_v12 = vmul.f32 0.0078125, %v549_v62 }
 0x117   : > { %v569_v33 = vpop.xlane.xlu0 %568  ;;  %v646_v30 = vmul.f32 %v1485_v18, %v1485_v18 }
 0x118   : > { %v645_v20 = vmul.f32 %v1481_v12, %v1481_v12 }
 0x11a   : > { %v578_v34 = vpop.xlane.xlu1 %577 }
 0x11b   : > { %v575_v35 = vpop.xlane.xlu0 %574 }
 0x11e   : > { %v584_v36 = vpop.xlane.xlu1 %583 }
 0x11f   : > { %v581_v37 = vpop.xlane.xlu0 %580 }
 0x122   : > { %v590_v38 = vpop.xlane.xlu1 %589 }
 0x123   : > { %v587_v39 = vpop.xlane.xlu0 %586 }
 0x126   : > { %v604_v41 = vpop.xlane.xlu1 %603 }
 0x127   : > { %v601_v40 = vpop.xlane.xlu0 %600  ;;  %v624_v55 = vadd.f32 %v604_v41, %v572_v32 }
 0x128   : > { %v623_v50 = vadd.f32 %v601_v40, %v569_v33  ;;  %v644_v33 = vmul.f32 %v1487_v22, %v1487_v22 }
 0x129   : > { %v632_v2 = vmul.f32 0.0078125, %v624_v55 }
 0x12a   : > { %v610_v43 = vpop.xlane.xlu1 %609  ;;  %v631_v59 = vmul.f32 0.0078125, %v623_v50  ;;  %v687_v50 = vmul.f32 %v1502_v44, %v1465_v52 }
 0x12b   : > { %v607_v42 = vpop.xlane.xlu0 %606  ;;  %v626_v53 = vadd.f32 %v610_v43, %v578_v34  ;;  %v648_v16 = vsub.f32 %v632_v2, %v640_v8 }
 0x12c   : > { %v625_v48 = vadd.f32 %v607_v42, %v575_v35  ;;  %v647_v10 = vsub.f32 %v631_v59, %v639_v0  ;;  %v685_v59 = vmul.f32 %v1502_v44, %v1467_v54  ;;  %v856_v54 = vld [vmem:[%s1563_s3 + $0x1] ss:$0 sm:$0xff] }
 0x12d   : > { %v634_v63 = vmul.f32 0.0078125, %v626_v53  ;;  %v656_v28 = vmax.f32 %v648_v16, 0.0 }
 0x12e   : > { %v616_v51 = vpop.xlane.xlu1 %615  ;;  %v633_v57 = vmul.f32 0.0078125, %v625_v48  ;;  %v655_v23 = vmax.f32 %v647_v10, 0.0 }
 0x12f   : > { %v613_v46 = vpop.xlane.xlu0 %612  ;;  %v650_v13 = vsub.f32 %v634_v63, %v642_v4  ;;  %v628_v17 = vadd.f32 %v616_v51, %v584_v36  ;;  %v688_v63 = vmul.f32 %v1502_v44, %v1469_v56  ;;  %v686_v4 = vmul.f32 %v1502_v44, %v1471_v58 }
 0x130   : > { %v649_v6 = vsub.f32 %v633_v57, %v641_v61  ;;  %v627_v11 = vadd.f32 %v613_v46, %v581_v37  ;;  %v663_v34 = vadd.f32 1e-05, %v655_v23  ;;  %v691_v23 = vmul.f32 %v1502_v44, %v1481_v12 }
 0x131   : > { %v658_v25 = vmax.f32 %v650_v13, 0.0  ;;  %v636_v29 = vmul.f32 0.0078125, %v628_v17 }
 0x132   : > { %v622_v3 = vpop.xlane.xlu1 %621  ;;  %v657_v19 = vmax.f32 %v649_v6, 0.0  ;;  %v635_v24 = vmul.f32 0.0078125, %v627_v11 }
 0x133   : > { %v619_v60 = vpop.xlane.xlu0 %618  ;;  %v630_v14 = vadd.f32 %v622_v3, %v590_v38  ;;  %v666_v36 = vadd.f32 1e-05, %v658_v25  ;;  %v664_v38 = vadd.f32 1e-05, %v656_v28 }
 0x134   : > { %v629_v7 = vadd.f32 %v619_v60, %v587_v39  ;;  %v665_v31 = vadd.f32 1e-05, %v657_v19  ;;  %v651_v35 = vsub.f32 %v635_v24, %v643_v27  ;;  %v652_v39 = vsub.f32 %v636_v29, %v644_v33 }
 0x135   : > { %v638_v26 = vmul.f32 0.0078125, %v630_v14  ;;  %v689_v27 = vmul.f32 %v1502_v44, %v1483_v15  ;;  %v690_v15 = vmul.f32 %v1502_v44, %v1487_v22 }
 0x136   : > { %v637_v21 = vmul.f32 0.0078125, %v629_v7  ;;  %989 = vrsqrt.f32 %v665_v31  ;;  %v659_v41 = vmax.f32 %v651_v35, 0.0  ;;  %v660_v43 = vmax.f32 %v652_v39, 0.0 }
 0x137   : > { %v654_v37 = vsub.f32 %v638_v26, %v646_v30  ;;  %991 = vrsqrt.f32 %v663_v34 }
 0x138   : > { %v653_v32 = vsub.f32 %v637_v21, %v645_v20  ;;  %993 = vrsqrt.f32 %v666_v36  ;;  %v667_v46 = vadd.f32 1e-05, %v659_v41  ;;  %v668_v51 = vadd.f32 1e-05, %v660_v43 }
 0x139   : > { %v662_v42 = vmax.f32 %v654_v37, 0.0  ;;  %995 = vrsqrt.f32 %v664_v38 }
 0x13a   : > { %v661_v40 = vmax.f32 %v653_v32, 0.0  ;;  %v692_v32 = vmul.f32 %v1502_v44, %v1485_v18 }
 0x13b   : > { %v670_v47 = vadd.f32 1e-05, %v662_v42 }
 0x13c   : > { %v669_v45 = vadd.f32 1e-05, %v661_v40 }
 0x13e   : > { %997 = vrsqrt.f32 %v669_v45 }
 0x13f   : > { %999 = vrsqrt.f32 %v667_v46 }
 0x140   : > { %v990_v3 = vpop.eup %989  ;;  %1001 = vrsqrt.f32 %v670_v47 }
 0x141   : > { %v992_v7 = vpop.eup %991  ;;  %1003 = vrsqrt.f32 %v668_v51 }
 0x142   : > { %v994_v9 = vpop.eup %993 }
 0x143   : > { %v996_v11 = vpop.eup %995 }
 0x148   : > { %v998_v36 = vpop.eup %997 }
 0x149   : > { %v1000_v39 = vpop.eup %999 }
 0x14a   : > { %v1002_v41 = vpop.eup %1001 }
 0x14b   : > { %v1004_v45 = vpop.eup %1003 }
 0x14d   : > { %v887_v48 = vpop.f32.mrb[0].mxu1 }
 0x14e   : > { %v903_v49 = vpop.f32.mrb[0].mxu0  ;;  %v363_v55 = vpop.f32.mrb[1].mxu1 }
 0x14f   : > { %v473_v53 = vadd.f32 %v903_v49, %v887_v48  ;;  %v464_v57 = vpop.f32.mrb[1].mxu0  ;;  %v888_v61 = vpop.f32.mrb[2].mxu1 }
 0x150   : > { %v465_v60 = vadd.f32 %v464_v57, %v363_v55  ;;  %v904_v62 = vpop.f32.mrb[2].mxu0  ;;  %v366_v2 = vpop.f32.mrb[3].mxu1 }
 0x151   : > { %v695_v0 = vsub.f32 %v473_v53, %v687_v50  ;;  %v476_v1 = vadd.f32 %v904_v62, %v888_v61  ;;  %v467_v52 = vpop.f32.mrb[3].mxu0 }
 0x152   : > { %v693_v5 = vsub.f32 %v465_v60, %v685_v59  ;;  %v468_v6 = vadd.f32 %v467_v52, %v366_v2 }
 0x153   : > { %v703_v56 = vmul.f32 %v990_v3, %v695_v0  ;;  %v696_v8 = vsub.f32 %v476_v1, %v688_v63 }
 0x154   : > { %v701_v10 = vmul.f32 %v992_v7, %v693_v5  ;;  %v694_v58 = vsub.f32 %v468_v6, %v686_v4 }
 0x155   : > { %v715_v13 = vadd.f32 %v856_v54, %v703_v56  ;;  %v704_v14 = vmul.f32 %v994_v9, %v696_v8  ;;  %v891_v19 = vpop.f32.mrb[4].mxu1 }
 0x156   : > { %v713_v16 = vadd.f32 %v856_v54, %v701_v10  ;;  %v702_v17 = vmul.f32 %v996_v11, %v694_v58  ;;  %v907_v21 = vpop.f32.mrb[4].mxu0  ;;  %v379_v25 = vpop.f32.mrb[5].mxu1 }
 0x157   : > { %723 = vst.msk [vmem:[%s1521_s28 + $0x10] sm:$0xff] %vm316_vm0, %v715_v13  ;;  %v716_v24 = vadd.f32 %v856_v54, %v704_v14  ;;  %v489_v20 = vadd.f32 %v907_v21, %v891_v19  ;;  %v480_v26 = vpop.f32.mrb[5].mxu0  ;;  %v892_v30 = vpop.f32.mrb[6].mxu1 }
 0x158   : > { %721 = vst.msk [vmem:[%s1521_s28] sm:$0xff] %vm316_vm0, %v713_v16  ;;  %v714_v28 = vadd.f32 %v856_v54, %v702_v17  ;;  %v481_v29 = vadd.f32 %v480_v26, %v379_v25  ;;  %v908_v31 = vpop.f32.mrb[6].mxu0  ;;  %v382_v34 = vpop.f32.mrb[7].mxu1 }
 0x159   : > { %724 = vst.msk [vmem:[%s1521_s28 + $0x18] sm:$0xff] %vm316_vm0, %v716_v24  ;;  %v699_v12 = vsub.f32 %v489_v20, %v691_v23  ;;  %v492_v33 = vadd.f32 %v908_v31, %v892_v30  ;;  %v483_v35 = vpop.f32.mrb[7].mxu0 }
 0x15a   : > { %722 = vst.msk [vmem:[%s1521_s28 + $0x8] sm:$0xff] %vm316_vm0, %v714_v28  ;;  %v697_v37 = vsub.f32 %v481_v29, %v689_v27  ;;  %v484_v38 = vadd.f32 %v483_v35, %v382_v34 }
 0x15b   : > { %v707_v18 = vmul.f32 %v998_v36, %v699_v12  ;;  %v700_v40 = vsub.f32 %v492_v33, %v692_v32 }
 0x15c   : > { %v705_v42 = vmul.f32 %v1000_v39, %v697_v37  ;;  %v698_v43 = vsub.f32 %v484_v38, %v690_v15 }
 0x15d   : > { %v719_v46 = vadd.f32 %v856_v54, %v707_v18  ;;  %v708_v47 = vmul.f32 %v1002_v41, %v700_v40 }
 0x15e   : > { %v717_v48 = vadd.f32 %v856_v54, %v705_v42  ;;  %v706_v49 = vmul.f32 %v1004_v45, %v698_v43 }
 0x15f   : > { %727 = vst.msk [vmem:[%s1521_s28 + $0x30] sm:$0xff] %vm316_vm0, %v719_v46  ;;  %v720_v22 = vadd.f32 %v856_v54, %v708_v47 }
 0x160   : > { %725 = vst.msk [vmem:[%s1521_s28 + $0x20] sm:$0xff] %vm316_vm0, %v717_v48  ;;  %v718_v44 = vadd.f32 %v856_v54, %v706_v49 }
 0x161   : > { %728 = vst.msk [vmem:[%s1521_s28 + $0x38] sm:$0xff] %vm316_vm0, %v720_v22 }
 0x162   : > { %726 = vst.msk [vmem:[%s1521_s28 + $0x28] sm:$0xff] %vm316_vm0, %v718_v44 }
 0x163 PF: > { %p15_p6 = scmp.ge.s32.totalorder %s1259_s7, 4   ;;  %s1577_s15 = smov %s1121_s16 }
 0x164   : > { %s1578_s16 = smov %s1125_s17  ;;  %s1579_s17 = smov %s1270_s12 }
 0x165   : > { %s1580_s18 = smov %s1259_s7  ;;  %17 = sbr.rel (!%p15_p6) target bundleno = 4 (0x4), region = 85 }
 0x16c   :  { %751 = vsyncpa [#allocation3], 1 }
 0x16d   :  { %753 = vsyncpa [#allocation3 + $0x1], 1 }
 0x16e   :  { %754 = vsyncpa [#allocation5], 1 }

</bundles_post_ra>
